<compile_context>
chip_gen: v5e
topology: v5e:2x2
jax: 0.10.0
libtpu: 0.0.40
codegen_flags: <defaults>
</compile_context>

<pallas_src>
import functools

import numpy as np
import jax
import jax.numpy as jnp
from jax import lax
from jax.experimental import pallas as pl
from jax.experimental.pallas import tpu as pltpu


def _round_up(x, m):
    return ((x + m - 1) // m) * m


def _choose_tile(dim, target):
    """Largest tile <= target that divides dim (dim is a multiple of 128)."""
    t = min(target, dim)
    while dim % t:
        t -= 128
    return t


def _vmem_limit_bytes():
    # v7x: 64 MiB VMEM/TC -> stay <= ~48 MiB; v5e/v6e: 128 MiB physical -> allow
    # up to ~96 MiB.  The default tile configuration uses well under 16 MiB.
    try:
        cap = pltpu.get_tpu_info().vmem_capacity_bytes
    except Exception:
        cap = 64 * 1024 * 1024
    return int(min(cap * 3 // 4, 96 * 1024 * 1024))


_VMEM_LIMIT = _vmem_limit_bytes()


# ---------------------------------------------------------------------------
# Kernel 1: one LightGCN propagation layer, fused with the running layer sum.
#   streamed:  graph tiles (tm, tk) bf16           (dominant HBM stream)
#   resident:  full (n_pad, d_pad) bf16 embedding  (loaded once)
#   outputs:   bf16 layer output (next layer RHS) + f32 running sum (aliased in)
# ---------------------------------------------------------------------------
def _lightgcn_layer_kernel(g_ref, e_ref, acc_in_ref, layer_ref, acc_out_ref, mm_acc):
    k = pl.program_id(1)
    tk = g_ref.shape[1]

    @pl.when(k == 0)
    def _():
        mm_acc[...] = jnp.zeros_like(mm_acc)

    # Resident embedding: slice the k-th reduction block (no per-row-tile re-DMA).
    e_blk = e_ref[pl.ds(pl.multiple_of(k * tk, 128), tk), :]
    mm_acc[...] += jnp.dot(g_ref[...], e_blk, preferred_element_type=jnp.float32)

    @pl.when(k == pl.num_programs(1) - 1)
    def _():
        layer_out = mm_acc[...]
        layer_ref[...] = layer_out.astype(layer_ref.dtype)      # bf16 RHS for next layer
        acc_out_ref[...] = acc_in_ref[...] + layer_out          # f32 running layer sum


def lightgcn_layer(graph_bf16, emb_bf16, acc_f32, *, tm_target=512, tk_target=2048):
    """One propagation step.  Returns (G @ emb as bf16, acc_f32 + G @ emb as f32)."""
    n_pad = graph_bf16.shape[0]
    d_pad = emb_bf16.shape[1]
    # Keep >= 4 row tiles when possible (megacore balance + pipeline depth).
    tm = _choose_tile(n_pad, min(tm_target, max(128, _round_up(n_pad // 4, 128))))
    tk = _choose_tile(n_pad, tk_target)
    grid = (n_pad // tm, n_pad // tk)

    graph_spec = pl.BlockSpec((tm, tk), lambda i, k: (i, k))
    if grid[1] >= 3:
        # Deeper pipeline on the dominant graph stream (helps when DMA latency is
        # exposed, e.g. v7x with its 64 MiB VMEM but 3.2 TB/s HBM).
        try:
            graph_spec = pl.BlockSpec((tm, tk), lambda i, k: (i, k),
                                      pipeline_mode=pl.Buffered(3))
        except Exception:
            pass  # older API without pipeline_mode: fall back to default buffering

    layer_out, acc_out = pl.pallas_call(
        _lightgcn_layer_kernel,
        out_shape=(jax.ShapeDtypeStruct((n_pad, d_pad), jnp.bfloat16),
                   jax.ShapeDtypeStruct((n_pad, d_pad), jnp.float32)),
        grid=grid,
        in_specs=[
            graph_spec,                                          # streamed graph tiles
            pl.BlockSpec((n_pad, d_pad), lambda i, k: (0, 0)),   # resident embedding
            pl.BlockSpec((tm, d_pad), lambda i, k: (i, 0)),      # running sum (aliased)
        ],
        out_specs=(
            pl.BlockSpec((tm, d_pad), lambda i, k: (i, 0)),      # bf16 layer output
            pl.BlockSpec((tm, d_pad), lambda i, k: (i, 0)),      # f32 running sum
        ),
        scratch_shapes=[pltpu.VMEM((tm, d_pad), jnp.float32)],
        input_output_aliases={2: 1},
        compiler_params=pltpu.CompilerParams(
            dimension_semantics=("parallel", "arbitrary"),
            vmem_limit_bytes=_VMEM_LIMIT),
    )(graph_bf16, emb_bf16, acc_f32)
    return layer_out, acc_out


# ---------------------------------------------------------------------------
# Kernel 2a: row-tiled normalize + alignment partial sums
# ---------------------------------------------------------------------------
def _normalize_align_kernel(u_ref, v_ref, un_ref, vn_ref, part_ref):
    u = u_ref[...]
    v = v_ref[...]
    # F.normalize(x, dim=-1): x / max(||x||_2, 1e-12).  Padded zero rows stay zero.
    un = u / jnp.maximum(jnp.sqrt(jnp.sum(u * u, axis=-1, keepdims=True)), 1e-12)
    vn = v / jnp.maximum(jnp.sqrt(jnp.sum(v * v, axis=-1, keepdims=True)), 1e-12)
    un_ref[...] = un
    vn_ref[...] = vn
    d = un - vn                                   # padded rows contribute exactly 0
    part_ref[...] = jnp.broadcast_to(jnp.sum(d * d), part_ref.shape)


# ---------------------------------------------------------------------------
# Kernel 2b: flash-style tiled lunif pair sum over strict upper-triangular blocks
# ---------------------------------------------------------------------------
def _make_lunif_kernel(batch, tb, t):
    def kernel(xq_ref, xk_ref, o_ref):
        qi = pl.program_id(0)
        ki = pl.program_id(1)

        @pl.when(ki == 0)
        def _():
            o_ref[...] = jnp.zeros_like(o_ref)

        # Only j >= i blocks do work; lower-triangular blocks are skipped (halves
        # the B^2 exp stream through the single EUP slot).
        @pl.when(ki >= qi)
        def _():
            xq = xq_ref[...]
            xk = xk_ref[...]
            sq_q = jnp.sum(xq * xq, axis=-1, keepdims=True)                # (tb, 1)
            sq_k = jnp.sum(xk * xk, axis=-1, keepdims=True)                # (tb, 1)
            gram = lax.dot_general(xq, xk, (((1,), (1,)), ((), ())),
                                   preferred_element_type=jnp.float32)
            d2 = jnp.maximum(sq_q + jnp.transpose(sq_k) - 2.0 * gram, 0.0)
            row = qi * tb + lax.broadcasted_iota(jnp.int32, (tb, tb), 0)
            col = ki * tb + lax.broadcasted_iota(jnp.int32, (tb, tb), 1)
            # Strict i < j pairs only, and only rows/cols that are real (not padding).
            mask = (col > row) & (row < batch) & (col < batch)
            o_ref[...] += jnp.sum(jnp.where(mask, jnp.exp(-t * d2), 0.0))
    return kernel


def _lunif_pair_sum(x_norm, batch, tb, t):
    """sum_{i<j, both valid} exp(-t * ||x_i - x_j||^2), tiled over (q, k) blocks."""
    b_pad, d_pad = x_norm.shape
    nb = b_pad // tb
    parts = pl.pallas_call(
        _make_lunif_kernel(batch, tb, t),
        out_shape=jax.ShapeDtypeStruct((nb, 128), jnp.float32),
        grid=(nb, nb),
        in_specs=[pl.BlockSpec((tb, d_pad), lambda qi, ki: (qi, 0)),
                  pl.BlockSpec((tb, d_pad), lambda qi, ki: (ki, 0))],
        out_specs=pl.BlockSpec((1, 128), lambda qi, ki: (qi, 0)),   # per-q partial, resident over k
        compiler_params=pltpu.CompilerParams(
            dimension_semantics=("parallel", "arbitrary"),
            vmem_limit_bytes=_VMEM_LIMIT),
    )(x_norm, x_norm)
    return jnp.sum(parts[:, 0])


def au_losses(users_emb, items_emb, *, t=2.0, tb_target=256):
    """align = mean_i ||normalize(u_i) - normalize(v_i)||^2
       unif  = (lunif(u) + lunif(v)) / 2, lunif(x) = log(mean_{i<j} exp(-t*||x_i-x_j||^2))
    """
    B, d_pad = users_emb.shape
    n_pairs = float(B * (B - 1) / 2.0)
    tb = min(tb_target, _round_up(B, 8))
    b_pad = _round_up(B, tb)
    nb = b_pad // tb

    u_p = jnp.zeros((b_pad, d_pad), jnp.float32).at[:B].set(users_emb)
    v_p = jnp.zeros((b_pad, d_pad), jnp.float32).at[:B].set(items_emb)

    un, vn, align_parts = pl.pallas_call(
        _normalize_align_kernel,
        out_shape=(jax.ShapeDtypeStruct((b_pad, d_pad), jnp.float32),
                   jax.ShapeDtypeStruct((b_pad, d_pad), jnp.float32),
                   jax.ShapeDtypeStruct((nb, 128), jnp.float32)),
        grid=(nb,),
        in_specs=[pl.BlockSpec((tb, d_pad), lambda i: (i, 0)),
                  pl.BlockSpec((tb, d_pad), lambda i: (i, 0))],
        out_specs=(pl.BlockSpec((tb, d_pad), lambda i: (i, 0)),
                   pl.BlockSpec((tb, d_pad), lambda i: (i, 0)),
                   pl.BlockSpec((1, 128), lambda i: (i, 0))),
        compiler_params=pltpu.CompilerParams(
            dimension_semantics=("parallel",),
            vmem_limit_bytes=_VMEM_LIMIT),
    )(u_p, v_p)

    align = jnp.sum(align_parts[:, 0]) / float(B)
    unif = 0.5 * (jnp.log(_lunif_pair_sum(un, B, tb, t) / n_pairs)
                  + jnp.log(_lunif_pair_sum(vn, B, tb, t) / n_pairs))
    return align, unif


# ---------------------------------------------------------------------------
# Forward wrapper (pad / concat / gather / scalar glue in plain JAX, jitted)
# ---------------------------------------------------------------------------
@functools.partial(jax.jit, static_argnums=(5, 6))
def graphau_forward(graph, user_emb, item_emb, users, items, num_users, num_layers):
    N = graph.shape[0]
    D = user_emb.shape[1]
    num_items = N - num_users
    n_pad = _round_up(N, 128)
    d_pad = _round_up(D, 128)

    all_emb = jnp.concatenate([user_emb, item_emb], axis=0)                 # (N, D) f32
    emb_p = jnp.zeros((n_pad, d_pad), jnp.float32).at[:N, :D].set(all_emb)
    # Padded graph built directly in bf16 (no padded f32 intermediate + cast pass).
    graph_bf16 = (jnp.zeros((n_pad, n_pad), jnp.bfloat16)
                  .at[:N, :N].set(graph.astype(jnp.bfloat16)))
    # TODO(synk): production graphs are >99% sparse — replace this dense (N,N)
    # stream with block-sparse tiles selected via PrefetchScalarGridSpec, and/or
    # int8 (v5e/v6e) / fp8 (v7x) graph storage; validate loss drift vs f32.

    # LightGCN propagation: light_out = mean over [E, G@E, G@(G@E), ...].
    # Running layer sum is carried through the kernel (aliased f32 accumulator);
    # each layer also emits its bf16 output as the next layer's resident RHS.
    acc = emb_p
    cur_bf16 = emb_p.astype(jnp.bfloat16)
    for _ in range(num_layers):
        cur_bf16, acc = lightgcn_layer(graph_bf16, cur_bf16, acc)
    light_out = acc * (1.0 / float(num_layers + 1))                         # (n_pad, d_pad)

    all_users = light_out[:num_users]
    all_items = light_out[num_users:num_users + num_items]
    u = all_users[users]        # embedding gather (plain-JAX glue), (B, d_pad)
    v = all_items[items]
    return au_losses(u, v)


# ---------------------------------------------------------------------------
# Graph construction (getSparseGraph / norm_adj_single), host-side numpy
# ---------------------------------------------------------------------------
def build_norm_adjacency(train_data, num_users, num_items):
    N = num_users + num_items
    A = np.zeros((N, N), dtype=np.float32)
    for u, i in train_data:
        A[u, num_users + i] = 1.0
        A[num_users + i, u] = 1.0
    rowsum = A.sum(axis=1)
    d_inv = np.zeros_like(rowsum)
    nz = rowsum > 0
    d_inv[nz] = rowsum[nz] ** -0.5
    norm_A = (d_inv[:, None] * A) * d_inv[None, :]
    return jnp.asarray(norm_A, dtype=jnp.float32)


if __name__ == "__main__":
    # Small synthetic config
    num_users, num_items = 12, 20
    embedding_size = 32
    num_layers = 2        # args.layer
    batch = 8

    # Deterministic synthetic interaction data (user, item) pairs
    train_data = [(u, (u * 7 + k) % num_items)
                  for u in range(num_users) for k in range(3)]
    graph = build_norm_adjacency(train_data, num_users, num_items)

    # Parameters: nn.init.normal_(w, 0, 0.01), deterministic via PRNGKey(0)
    key = jax.random.PRNGKey(0)
    k1, k2, k3, k4 = jax.random.split(key, 4)
    user_emb = 0.01 * jax.random.normal(
        k1, (num_users, embedding_size), dtype=jnp.float32)
    item_emb = 0.01 * jax.random.normal(
        k2, (num_items, embedding_size), dtype=jnp.float32)

    # Forward inputs: index batches
    users = jax.random.randint(k3, (batch,), 0, num_users, dtype=jnp.int32)
    items = jax.random.randint(k4, (batch,), 0, num_items, dtype=jnp.int32)

    align_loss, unif_loss = graphau_forward(
        graph, user_emb, item_emb, users, items, num_users, num_layers)
    jax.block_until_ready((align_loss, unif_loss))

    assert np.isfinite(float(align_loss)) and np.isfinite(float(unif_loss))
    print("KERNEL_OK")
</pallas_src>

<mosaic_0001>
module attributes {stable_mosaic.version = 11 : i64} {
  func.func @_lightgcn_layer_kernel(%arg0: i32, %arg1: i32, %arg2: memref<128x128xbf16, #tpu.memory_space<vmem>>, %arg3: memref<128x128xbf16, #tpu.memory_space<vmem>>, %arg4: memref<128x128xf32, #tpu.memory_space<vmem>>, %arg5: memref<128x128xbf16, #tpu.memory_space<vmem>>, %arg6: memref<128x128xf32, #tpu.memory_space<vmem>>, %arg7: memref<128x128xf32, #tpu.memory_space<vmem>>) attributes {dimension_semantics = [#tpu.dimension_semantics<parallel>, #tpu.dimension_semantics<arbitrary>], iteration_bounds = array<i64: 1, 1>, scalar_prefetch = 0 : i64, scratch_operands = 1 : i64, tpu.core_type = #tpu.core_type<tc>, window_params = [{transform_indices = @transform_0, window_bounds = array<i64: 128, 128>}, {pipeline_mode = #tpu.pipeline_mode<synchronous>, transform_indices = @transform_1, window_bounds = array<i64: 128, 128>}, {transform_indices = @transform_2, window_bounds = array<i64: 128, 128>}, {transform_indices = @transform_3, window_bounds = array<i64: 128, 128>}, {transform_indices = @transform_4, window_bounds = array<i64: 128, 128>}]} {
    %c0_i32 = arith.constant 0 : i32
    %0 = arith.cmpi eq, %arg1, %c0_i32 : i32
    %1 = arith.extui %0 : i1 to i32
    %c0_i32_0 = arith.constant 0 : i32
    %2 = arith.cmpi ne, %1, %c0_i32_0 : i32
    scf.if %2 {
      %cst_9 = arith.constant 0.000000e+00 : f32
      %15 = vector.broadcast %cst_9 : f32 to vector<128x128xf32>
      %c0_10 = arith.constant 0 : index
      %c0_11 = arith.constant 0 : index
      %16 = vector.load %arg7[%c0_10, %c0_11] : memref<128x128xf32, #tpu.memory_space<vmem>>, vector<128x128xf32>
      tpu.vector_store %arg7[%c0_10, %c0_11], %15 {strides = array<i32>} : memref<128x128xf32, #tpu.memory_space<vmem>>, vector<128x128xf32>,
    } else {
    }
    %c128_i32 = arith.constant 128 : i32
    %3 = arith.muli %arg1, %c128_i32 : i32
    %4 = tpu.assume_multiple %3, 128 : i32
    %5 = arith.index_cast %4 : i32 to index
    %c0 = arith.constant 0 : index
    %6 = vector.load %arg3[%5, %c0] : memref<128x128xbf16, #tpu.memory_space<vmem>>, vector<128x128xbf16>
    %c0_1 = arith.constant 0 : index
    %c0_2 = arith.constant 0 : index
    %7 = vector.load %arg7[%c0_1, %c0_2] : memref<128x128xf32, #tpu.memory_space<vmem>>, vector<128x128xf32>
    %c0_3 = arith.constant 0 : index
    %c0_4 = arith.constant 0 : index
    %8 = vector.load %arg2[%c0_3, %c0_4] : memref<128x128xbf16, #tpu.memory_space<vmem>>, vector<128x128xbf16>
    %cst = arith.constant dense<0.000000e+00> : vector<128x128xf32>
    %9 = tpu.matmul %8, %6, %cst {dimension_numbers = #tpu.dot_dimension_numbers<[1], [0], [0], [1], [0, 0, 1, 1], [], []>} : vector<128x128xbf16>, vector<128x128xbf16>, vector<128x128xf32> -> vector<128x128xf32>
    %10 = arith.addf %7, %9 : vector<128x128xf32>
    %c0_5 = arith.constant 0 : index
    %c0_6 = arith.constant 0 : index
    %11 = vector.load %arg7[%c0_5, %c0_6] : memref<128x128xf32, #tpu.memory_space<vmem>>, vector<128x128xf32>
    tpu.vector_store %arg7[%c0_5, %c0_6], %10 {strides = array<i32>} : memref<128x128xf32, #tpu.memory_space<vmem>>, vector<128x128xf32>,
    %c0_i32_7 = arith.constant 0 : i32
    %12 = arith.cmpi eq, %arg1, %c0_i32_7 : i32
    %13 = arith.extui %12 : i1 to i32
    %c0_i32_8 = arith.constant 0 : i32
    %14 = arith.cmpi ne, %13, %c0_i32_8 : i32
    scf.if %14 {
      %c0_9 = arith.constant 0 : index
      %c0_10 = arith.constant 0 : index
      %15 = vector.load %arg7[%c0_9, %c0_10] : memref<128x128xf32, #tpu.memory_space<vmem>>, vector<128x128xf32>
      %16 = arith.truncf %15 : vector<128x128xf32> to vector<128x128xbf16>
      %c0_11 = arith.constant 0 : index
      %c0_12 = arith.constant 0 : index
      %17 = vector.load %arg5[%c0_11, %c0_12] : memref<128x128xbf16, #tpu.memory_space<vmem>>, vector<128x128xbf16>
      tpu.vector_store %arg5[%c0_11, %c0_12], %16 {strides = array<i32>} : memref<128x128xbf16, #tpu.memory_space<vmem>>, vector<128x128xbf16>,
      %c0_13 = arith.constant 0 : index
      %c0_14 = arith.constant 0 : index
      %18 = vector.load %arg4[%c0_13, %c0_14] : memref<128x128xf32, #tpu.memory_space<vmem>>, vector<128x128xf32>
      %19 = arith.addf %18, %15 : vector<128x128xf32>
      %c0_15 = arith.constant 0 : index
      %c0_16 = arith.constant 0 : index
      %20 = vector.load %arg6[%c0_15, %c0_16] : memref<128x128xf32, #tpu.memory_space<vmem>>, vector<128x128xf32>
      tpu.vector_store %arg6[%c0_15, %c0_16], %19 {strides = array<i32>} : memref<128x128xf32, #tpu.memory_space<vmem>>, vector<128x128xf32>,
    } else {
    }
    return
  }
  func.func @transform_0(%arg0: i32, %arg1: i32) -> (i32, i32) {
    %c0_i32 = arith.constant 0 : i32
    return %arg0, %arg1 : i32, i32
  }
  func.func @transform_1(%arg0: i32, %arg1: i32) -> (i32, i32) {
    %c0_i32 = arith.constant 0 : i32
    %c0_i32_0 = arith.constant 0 : i32
    %c0_i32_1 = arith.constant 0 : i32
    return %c0_i32, %c0_i32_0 : i32, i32
  }
  func.func @transform_2(%arg0: i32, %arg1: i32) -> (i32, i32) {
    %c0_i32 = arith.constant 0 : i32
    %c0_i32_0 = arith.constant 0 : i32
    return %arg0, %c0_i32 : i32, i32
  }
  func.func @transform_3(%arg0: i32, %arg1: i32) -> (i32, i32) {
    %c0_i32 = arith.constant 0 : i32
    %c0_i32_0 = arith.constant 0 : i32
    return %arg0, %c0_i32 : i32, i32
  }
  func.func @transform_4(%arg0: i32, %arg1: i32) -> (i32, i32) {
    %c0_i32 = arith.constant 0 : i32
    %c0_i32_0 = arith.constant 0 : i32
    return %arg0, %c0_i32 : i32, i32
  }
}

module attributes {stable_mosaic.version = 11 : i64} {
  func.func @_lightgcn_layer_kernel(%arg0: i32, %arg1: i32, %arg2: memref<128x128xbf16, #tpu.memory_space<vmem>>, %arg3: memref<128x128xbf16, #tpu.memory_space<vmem>>, %arg4: memref<128x128xf32, #tpu.memory_space<vmem>>, %arg5: memref<128x128xbf16, #tpu.memory_space<vmem>>, %arg6: memref<128x128xf32, #tpu.memory_space<vmem>>, %arg7: memref<128x128xf32, #tpu.memory_space<vmem>>) attributes {dimension_semantics = [#tpu.dimension_semantics<parallel>, #tpu.dimension_semantics<arbitrary>], iteration_bounds = array<i64: 1, 1>, scalar_prefetch = 0 : i64, scratch_operands = 1 : i64, tpu.core_type = #tpu.core_type<tc>, window_params = [{transform_indices = @transform_0, window_bounds = array<i64: 128, 128>}, {pipeline_mode = #tpu.pipeline_mode<synchronous>, transform_indices = @transform_1, window_bounds = array<i64: 128, 128>}, {transform_indices = @transform_2, window_bounds = array<i64: 128, 128>}, {transform_indices = @transform_3, window_bounds = array<i64: 128, 128>}, {transform_indices = @transform_4, window_bounds = array<i64: 128, 128>}]} {
    %c0_i32 = arith.constant 0 : i32
    %0 = arith.cmpi eq, %arg1, %c0_i32 : i32
    %1 = arith.extui %0 : i1 to i32
    %c0_i32_0 = arith.constant 0 : i32
    %2 = arith.cmpi ne, %1, %c0_i32_0 : i32
    scf.if %2 {
      %cst_9 = arith.constant 0.000000e+00 : f32
      %15 = vector.broadcast %cst_9 : f32 to vector<128x128xf32>
      %c0_10 = arith.constant 0 : index
      %c0_11 = arith.constant 0 : index
      %16 = vector.load %arg7[%c0_10, %c0_11] : memref<128x128xf32, #tpu.memory_space<vmem>>, vector<128x128xf32>
      tpu.vector_store %arg7[%c0_10, %c0_11], %15 {strides = array<i32>} : memref<128x128xf32, #tpu.memory_space<vmem>>, vector<128x128xf32>,
    } else {
    }
    %c128_i32 = arith.constant 128 : i32
    %3 = arith.muli %arg1, %c128_i32 : i32
    %4 = tpu.assume_multiple %3, 128 : i32
    %5 = arith.index_cast %4 : i32 to index
    %c0 = arith.constant 0 : index
    %6 = vector.load %arg3[%5, %c0] : memref<128x128xbf16, #tpu.memory_space<vmem>>, vector<128x128xbf16>
    %c0_1 = arith.constant 0 : index
    %c0_2 = arith.constant 0 : index
    %7 = vector.load %arg7[%c0_1, %c0_2] : memref<128x128xf32, #tpu.memory_space<vmem>>, vector<128x128xf32>
    %c0_3 = arith.constant 0 : index
    %c0_4 = arith.constant 0 : index
    %8 = vector.load %arg2[%c0_3, %c0_4] : memref<128x128xbf16, #tpu.memory_space<vmem>>, vector<128x128xbf16>
    %cst = arith.constant dense<0.000000e+00> : vector<128x128xf32>
    %9 = tpu.matmul %8, %6, %cst {dimension_numbers = #tpu.dot_dimension_numbers<[1], [0], [0], [1], [0, 0, 1, 1], [], []>} : vector<128x128xbf16>, vector<128x128xbf16>, vector<128x128xf32> -> vector<128x128xf32>
    %10 = arith.addf %7, %9 : vector<128x128xf32>
    %c0_5 = arith.constant 0 : index
    %c0_6 = arith.constant 0 : index
    %11 = vector.load %arg7[%c0_5, %c0_6] : memref<128x128xf32, #tpu.memory_space<vmem>>, vector<128x128xf32>
    tpu.vector_store %arg7[%c0_5, %c0_6], %10 {strides = array<i32>} : memref<128x128xf32, #tpu.memory_space<vmem>>, vector<128x128xf32>,
    %c0_i32_7 = arith.constant 0 : i32
    %12 = arith.cmpi eq, %arg1, %c0_i32_7 : i32
    %13 = arith.extui %12 : i1 to i32
    %c0_i32_8 = arith.constant 0 : i32
    %14 = arith.cmpi ne, %13, %c0_i32_8 : i32
    scf.if %14 {
      %c0_9 = arith.constant 0 : index
      %c0_10 = arith.constant 0 : index
      %15 = vector.load %arg7[%c0_9, %c0_10] : memref<128x128xf32, #tpu.memory_space<vmem>>, vector<128x128xf32>
      %16 = arith.truncf %15 : vector<128x128xf32> to vector<128x128xbf16>
      %c0_11 = arith.constant 0 : index
      %c0_12 = arith.constant 0 : index
      %17 = vector.load %arg5[%c0_11, %c0_12] : memref<128x128xbf16, #tpu.memory_space<vmem>>, vector<128x128xbf16>
      tpu.vector_store %arg5[%c0_11, %c0_12], %16 {strides = array<i32>} : memref<128x128xbf16, #tpu.memory_space<vmem>>, vector<128x128xbf16>,
      %c0_13 = arith.constant 0 : index
      %c0_14 = arith.constant 0 : index
      %18 = vector.load %arg4[%c0_13, %c0_14] : memref<128x128xf32, #tpu.memory_space<vmem>>, vector<128x128xf32>
      %19 = arith.addf %18, %15 : vector<128x128xf32>
      %c0_15 = arith.constant 0 : index
      %c0_16 = arith.constant 0 : index
      %20 = vector.load %arg6[%c0_15, %c0_16] : memref<128x128xf32, #tpu.memory_space<vmem>>, vector<128x128xf32>
      tpu.vector_store %arg6[%c0_15, %c0_16], %19 {strides = array<i32>} : memref<128x128xf32, #tpu.memory_space<vmem>>, vector<128x128xf32>,
    } else {
    }
    return
  }
  func.func @transform_0(%arg0: i32, %arg1: i32) -> (i32, i32) {
    %c0_i32 = arith.constant 0 : i32
    return %arg0, %arg1 : i32, i32
  }
  func.func @transform_1(%arg0: i32, %arg1: i32) -> (i32, i32) {
    %c0_i32 = arith.constant 0 : i32
    %c0_i32_0 = arith.constant 0 : i32
    %c0_i32_1 = arith.constant 0 : i32
    return %c0_i32, %c0_i32_0 : i32, i32
  }
  func.func @transform_2(%arg0: i32, %arg1: i32) -> (i32, i32) {
    %c0_i32 = arith.constant 0 : i32
    %c0_i32_0 = arith.constant 0 : i32
    return %arg0, %c0_i32 : i32, i32
  }
  func.func @transform_3(%arg0: i32, %arg1: i32) -> (i32, i32) {
    %c0_i32 = arith.constant 0 : i32
    %c0_i32_0 = arith.constant 0 : i32
    return %arg0, %c0_i32 : i32, i32
  }
  func.func @transform_4(%arg0: i32, %arg1: i32) -> (i32, i32) {
    %c0_i32 = arith.constant 0 : i32
    %c0_i32_0 = arith.constant 0 : i32
    return %arg0, %c0_i32 : i32, i32
  }
}

module attributes {stable_mosaic.version = 11 : i64} {
  func.func @_normalize_align_kernel(%arg0: i32, %arg1: memref<8x128xf32, #tpu.memory_space<vmem>>, %arg2: memref<8x128xf32, #tpu.memory_space<vmem>>, %arg3: memref<8x128xf32, #tpu.memory_space<vmem>>, %arg4: memref<8x128xf32, #tpu.memory_space<vmem>>, %arg5: memref<1x128xf32, #tpu.memory_space<vmem>>) attributes {dimension_semantics = [#tpu.dimension_semantics<parallel>], iteration_bounds = array<i64: 1>, scalar_prefetch = 0 : i64, scratch_operands = 0 : i64, tpu.core_type = #tpu.core_type<tc>, window_params = [{transform_indices = @transform_0, window_bounds = array<i64: 8, 128>}, {transform_indices = @transform_1, window_bounds = array<i64: 8, 128>}, {transform_indices = @transform_2, window_bounds = array<i64: 8, 128>}, {transform_indices = @transform_3, window_bounds = array<i64: 8, 128>}, {transform_indices = @transform_4, window_bounds = array<i64: 1, 128>}]} {
    %c0 = arith.constant 0 : index
    %c0_0 = arith.constant 0 : index
    %0 = vector.load %arg1[%c0, %c0_0] : memref<8x128xf32, #tpu.memory_space<vmem>>, vector<8x128xf32>
    %c0_1 = arith.constant 0 : index
    %c0_2 = arith.constant 0 : index
    %1 = vector.load %arg2[%c0_1, %c0_2] : memref<8x128xf32, #tpu.memory_space<vmem>>, vector<8x128xf32>
    %2 = arith.mulf %0, %0 : vector<8x128xf32>
    %cst = arith.constant dense<0.000000e+00> : vector<8xf32>
    %3 = vector.multi_reduction <add>, %2, %cst [1] : vector<8x128xf32> to vector<8xf32>
    %4 = vector.shape_cast %3 : vector<8xf32> to vector<8x1xf32>
    %5 = math.sqrt %4 : vector<8x1xf32>
    %cst_3 = arith.constant 9.99999996E-13 : f32
    %6 = vector.broadcast %cst_3 : f32 to vector<8x1xf32>
    %7 = arith.maximumf %5, %6 : vector<8x1xf32>
    %8 = vector.broadcast %7 : vector<8x1xf32> to vector<8x128xf32>
    %9 = arith.divf %0, %8 : vector<8x128xf32>
    %10 = arith.mulf %1, %1 : vector<8x128xf32>
    %cst_4 = arith.constant dense<0.000000e+00> : vector<8xf32>
    %11 = vector.multi_reduction <add>, %10, %cst_4 [1] : vector<8x128xf32> to vector<8xf32>
    %12 = vector.shape_cast %11 : vector<8xf32> to vector<8x1xf32>
    %13 = math.sqrt %12 : vector<8x1xf32>
    %cst_5 = arith.constant 9.99999996E-13 : f32
    %14 = vector.broadcast %cst_5 : f32 to vector<8x1xf32>
    %15 = arith.maximumf %13, %14 : vector<8x1xf32>
    %16 = vector.broadcast %15 : vector<8x1xf32> to vector<8x128xf32>
    %17 = arith.divf %1, %16 : vector<8x128xf32>
    %c0_6 = arith.constant 0 : index
    %c0_7 = arith.constant 0 : index
    %18 = vector.load %arg3[%c0_6, %c0_7] : memref<8x128xf32, #tpu.memory_space<vmem>>, vector<8x128xf32>
    tpu.vector_store %arg3[%c0_6, %c0_7], %9 {strides = array<i32>} : memref<8x128xf32, #tpu.memory_space<vmem>>, vector<8x128xf32>,
    %c0_8 = arith.constant 0 : index
    %c0_9 = arith.constant 0 : index
    %19 = vector.load %arg4[%c0_8, %c0_9] : memref<8x128xf32, #tpu.memory_space<vmem>>, vector<8x128xf32>
    tpu.vector_store %arg4[%c0_8, %c0_9], %17 {strides = array<i32>} : memref<8x128xf32, #tpu.memory_space<vmem>>, vector<8x128xf32>,
    %20 = arith.subf %9, %17 : vector<8x128xf32>
    %21 = arith.mulf %20, %20 : vector<8x128xf32>
    %22 = vector.shape_cast %21 : vector<8x128xf32> to vector<1x8x128xf32>
    %cst_10 = arith.constant dense<0.000000e+00> : vector<1xf32>
    %23 = vector.multi_reduction <add>, %22, %cst_10 [1, 2] : vector<1x8x128xf32> to vector<1xf32>
    %24 = vector.shape_cast %23 : vector<1xf32> to vector<1x1x1xf32>
    %25 = vector.extract %24[0, 0, 0] : f32 from vector<1x1x1xf32>
    %26 = vector.broadcast %25 : f32 to vector<1x128xf32>
    %c0_11 = arith.constant 0 : index
    %c0_12 = arith.constant 0 : index
    %27 = vector.load %arg5[%c0_11, %c0_12] : memref<1x128xf32, #tpu.memory_space<vmem>>, vector<1x128xf32>
    tpu.vector_store %arg5[%c0_11, %c0_12], %26 {strides = array<i32>} : memref<1x128xf32, #tpu.memory_space<vmem>>, vector<1x128xf32>,
    return
  }
  func.func @transform_0(%arg0: i32) -> (i32, i32) {
    %c0_i32 = arith.constant 0 : i32
    %c0_i32_0 = arith.constant 0 : i32
    return %arg0, %c0_i32 : i32, i32
  }
  func.func @transform_1(%arg0: i32) -> (i32, i32) {
    %c0_i32 = arith.constant 0 : i32
    %c0_i32_0 = arith.constant 0 : i32
    return %arg0, %c0_i32 : i32, i32
  }
  func.func @transform_2(%arg0: i32) -> (i32, i32) {
    %c0_i32 = arith.constant 0 : i32
    %c0_i32_0 = arith.constant 0 : i32
    return %arg0, %c0_i32 : i32, i32
  }
  func.func @transform_3(%arg0: i32) -> (i32, i32) {
    %c0_i32 = arith.constant 0 : i32
    %c0_i32_0 = arith.constant 0 : i32
    return %arg0, %c0_i32 : i32, i32
  }
  func.func @transform_4(%arg0: i32) -> (i32, i32) {
    %c0_i32 = arith.constant 0 : i32
    %c0_i32_0 = arith.constant 0 : i32
    return %arg0, %c0_i32 : i32, i32
  }
}

module attributes {stable_mosaic.version = 11 : i64} {
  func.func @kernel(%arg0: i32, %arg1: i32, %arg2: memref<8x128xf32, #tpu.memory_space<vmem>>, %arg3: memref<8x128xf32, #tpu.memory_space<vmem>>, %arg4: memref<1x128xf32, #tpu.memory_space<vmem>>) attributes {dimension_semantics = [#tpu.dimension_semantics<parallel>, #tpu.dimension_semantics<arbitrary>], iteration_bounds = array<i64: 1, 1>, scalar_prefetch = 0 : i64, scratch_operands = 0 : i64, tpu.core_type = #tpu.core_type<tc>, window_params = [{transform_indices = @transform_0, window_bounds = array<i64: 8, 128>}, {transform_indices = @transform_1, window_bounds = array<i64: 8, 128>}, {transform_indices = @transform_2, window_bounds = array<i64: 1, 128>}]} {
    %c0_i32 = arith.constant 0 : i32
    %0 = arith.cmpi eq, %arg1, %c0_i32 : i32
    %1 = arith.extui %0 : i1 to i32
    %c0_i32_0 = arith.constant 0 : i32
    %2 = arith.cmpi ne, %1, %c0_i32_0 : i32
    scf.if %2 {
      %cst = arith.constant 0.000000e+00 : f32
      %6 = vector.broadcast %cst : f32 to vector<1x128xf32>
      %c0 = arith.constant 0 : index
      %c0_2 = arith.constant 0 : index
      %7 = vector.load %arg4[%c0, %c0_2] : memref<1x128xf32, #tpu.memory_space<vmem>>, vector<1x128xf32>
      tpu.vector_store %arg4[%c0, %c0_2], %6 {strides = array<i32>} : memref<1x128xf32, #tpu.memory_space<vmem>>, vector<1x128xf32>,
    } else {
    }
    %3 = arith.cmpi sge, %arg1, %arg0 : i32
    %4 = arith.extui %3 : i1 to i32
    %c0_i32_1 = arith.constant 0 : i32
    %5 = arith.cmpi ne, %4, %c0_i32_1 : i32
    scf.if %5 {
      %c0 = arith.constant 0 : index
      %c0_2 = arith.constant 0 : index
      %6 = vector.load %arg2[%c0, %c0_2] : memref<8x128xf32, #tpu.memory_space<vmem>>, vector<8x128xf32>
      %c0_3 = arith.constant 0 : index
      %c0_4 = arith.constant 0 : index
      %7 = vector.load %arg3[%c0_3, %c0_4] : memref<8x128xf32, #tpu.memory_space<vmem>>, vector<8x128xf32>
      %8 = arith.mulf %6, %6 : vector<8x128xf32>
      %cst = arith.constant dense<0.000000e+00> : vector<8xf32>
      %9 = vector.multi_reduction <add>, %8, %cst [1] : vector<8x128xf32> to vector<8xf32>
      %10 = vector.shape_cast %9 : vector<8xf32> to vector<8x1xf32>
      %11 = arith.mulf %7, %7 : vector<8x128xf32>
      %cst_5 = arith.constant dense<0.000000e+00> : vector<8xf32>
      %12 = vector.multi_reduction <add>, %11, %cst_5 [1] : vector<8x128xf32> to vector<8xf32>
      %13 = vector.shape_cast %12 : vector<8xf32> to vector<8x1xf32>
      %cst_6 = arith.constant dense<0.000000e+00> : vector<8x8xf32>
      %14 = tpu.matmul %6, %7, %cst_6 {dimension_numbers = #tpu.dot_dimension_numbers<[1], [1], [0], [0], [0, 0, 1, 0], [], []>} : vector<8x128xf32>, vector<8x128xf32>, vector<8x8xf32> -> vector<8x8xf32>
      %15 = tpu.transpose %13, [1, 0] : vector<8x1xf32> -> vector<1x8xf32>
      %16 = vector.broadcast %10 : vector<8x1xf32> to vector<8x8xf32>
      %17 = vector.broadcast %15 : vector<1x8xf32> to vector<8x8xf32>
      %18 = arith.addf %16, %17 : vector<8x8xf32>
      %cst_7 = arith.constant 2.000000e+00 : f32
      %19 = vector.broadcast %cst_7 : f32 to vector<8x8xf32>
      %20 = arith.mulf %19, %14 : vector<8x8xf32>
      %21 = arith.subf %18, %20 : vector<8x8xf32>
      %cst_8 = arith.constant 0.000000e+00 : f32
      %22 = vector.broadcast %cst_8 : f32 to vector<8x8xf32>
      %23 = arith.maximumf %21, %22 : vector<8x8xf32>
      %c8_i32 = arith.constant 8 : i32
      %24 = arith.muli %arg0, %c8_i32 : i32
      %25 = tpu.iota {dimensions = array<i32: 0>} : vector<8x8xi32>
      %26 = vector.broadcast %24 : i32 to vector<8x8xi32>
      %27 = arith.addi %26, %25 : vector<8x8xi32>
      %c8_i32_9 = arith.constant 8 : i32
      %28 = arith.muli %arg1, %c8_i32_9 : i32
      %29 = tpu.iota {dimensions = array<i32: 1>} : vector<8x8xi32>
      %30 = vector.broadcast %28 : i32 to vector<8x8xi32>
      %31 = arith.addi %30, %29 : vector<8x8xi32>
      %32 = arith.cmpi sgt, %31, %27 : vector<8x8xi32>
      %c8_i32_10 = arith.constant 8 : i32
      %33 = vector.broadcast %c8_i32_10 : i32 to vector<8x8xi32>
      %34 = arith.cmpi slt, %27, %33 : vector<8x8xi32>
      %35 = arith.andi %32, %34 : vector<8x8xi1>
      %c8_i32_11 = arith.constant 8 : i32
      %36 = vector.broadcast %c8_i32_11 : i32 to vector<8x8xi32>
      %37 = arith.cmpi slt, %31, %36 : vector<8x8xi32>
      %38 = arith.andi %35, %37 : vector<8x8xi1>
      %c0_12 = arith.constant 0 : index
      %c0_13 = arith.constant 0 : index
      %39 = vector.load %arg4[%c0_12, %c0_13] : memref<1x128xf32, #tpu.memory_space<vmem>>, vector<1x128xf32>
      %cst_14 = arith.constant -2.000000e+00 : f32
      %40 = vector.broadcast %cst_14 : f32 to vector<8x8xf32>
      %41 = arith.mulf %40, %23 : vector<8x8xf32>
      %42 = math.exp %41 : vector<8x8xf32>
      %cst_15 = arith.constant 0.000000e+00 : f32
      %43 = vector.broadcast %cst_15 : f32 to vector<8x8xf32>
      %44 = arith.select %38, %42, %43 : vector<8x8xi1>, vector<8x8xf32>
      %45 = vector.shape_cast %44 : vector<8x8xf32> to vector<1x8x8xf32>
      %cst_16 = arith.constant dense<0.000000e+00> : vector<1xf32>
      %46 = vector.multi_reduction <add>, %45, %cst_16 [1, 2] : vector<1x8x8xf32> to vector<1xf32>
      %47 = vector.shape_cast %46 : vector<1xf32> to vector<1x1x1xf32>
      %48 = vector.extract %47[0, 0, 0] : f32 from vector<1x1x1xf32>
      %49 = vector.broadcast %48 : f32 to vector<1x128xf32>
      %50 = arith.addf %39, %49 : vector<1x128xf32>
      %c0_17 = arith.constant 0 : index
      %c0_18 = arith.constant 0 : index
      %51 = vector.load %arg4[%c0_17, %c0_18] : memref<1x128xf32, #tpu.memory_space<vmem>>, vector<1x128xf32>
      tpu.vector_store %arg4[%c0_17, %c0_18], %50 {strides = array<i32>} : memref<1x128xf32, #tpu.memory_space<vmem>>, vector<1x128xf32>,
    } else {
    }
    return
  }
  func.func @transform_0(%arg0: i32, %arg1: i32) -> (i32, i32) {
    %c0_i32 = arith.constant 0 : i32
    %c0_i32_0 = arith.constant 0 : i32
    return %arg0, %c0_i32 : i32, i32
  }
  func.func @transform_1(%arg0: i32, %arg1: i32) -> (i32, i32) {
    %c0_i32 = arith.constant 0 : i32
    %c0_i32_0 = arith.constant 0 : i32
    return %arg1, %c0_i32 : i32, i32
  }
  func.func @transform_2(%arg0: i32, %arg1: i32) -> (i32, i32) {
    %c0_i32 = arith.constant 0 : i32
    %c0_i32_0 = arith.constant 0 : i32
    return %arg0, %c0_i32 : i32, i32
  }
}

</mosaic_0001>

<bundles_post_ra>
// kernel: graphau_forward.7
= control target key start
LH: loop header
LB: loop body
LE: loop exit
PB: predicated region body
PF: predicated region fallthrough
CT: control target
= control target key end

     0   :  { %s160_s0 = inlined_call_operand.vmem [shape: f32[8,128], index: 0, kind: input, shape index: {}]   ;;  %s161_s1 = inlined_call_operand.vmem [shape: f32[8,128], index: 1, kind: input, shape index: {}]   ;;  %s162_s2 = inlined_call_operand.vmem [shape: f32[8,128], index: 2, kind: output, shape index: {0}]   ;;  %s163_s3 = inlined_call_operand.vmem [shape: f32[8,128], index: 3, kind: output, shape index: {1}]   ;;  %s164_s4 = inlined_call_operand.vmem [shape: f32[1,128], index: 4, kind: output, shape index: {2}]  }
   0x1   :  { %v14_v0 = vld [vmem:[%s160_s0] sm:$0xff] }
   0x2   :  { %v16_v1 = vmul.f32 %v14_v0, %v14_v0  ;;  %v146_v2 = vld [vmem:[%s161_s1] sm:$0xff] }
   0x3   :  { %v47_v3 = vmul.f32 %v146_v2, %v146_v2 }
   0x4   :  { %17 = vadd.xlane.f32.xlu0 %v16_v1 }
   0xc   :  { %48 = vadd.xlane.f32.xlu0 %v47_v3 }
  0x77   :  { %v18_v4 = vpop.xlane.xlu0 %17 }
  0x78   :  { %107 = vrsqrt.f32 %v18_v4  ;;  %vm26_vm0 = vcmp.eq.f32.partialorder %v18_v4, inf  ;;  %v29_v16 = vand.u32 2147483648, %v18_v4  ;;  %vm28_vm1 = vcmp.eq.f32.partialorder %v18_v4, 0.0 }
  0x7e   :  { %v108_v5 = vpop.eup %107 }
  0x7f   :  { %v20_v6 = vmul.f32 %v108_v5, %v18_v4  ;;  %v49_v7 = vpop.xlane.xlu0 %48 }
  0x80   :  { %109 = vrsqrt.f32 %v49_v7  ;;  %vm57_vm2 = vcmp.eq.f32.partialorder %v49_v7, inf  ;;  %v60_v24 = vand.u32 2147483648, %v49_v7  ;;  %vm59_vm3 = vcmp.eq.f32.partialorder %v49_v7, 0.0 }
  0x81   :  { %v21_v8 = vmul.f32 %v108_v5, %v20_v6 }
  0x83   :  { %v22_v9 = vmul.f32 0.5, %v21_v8 }
  0x85   :  { %v23_v10 = vsub.f32 1.5, %v22_v9 }
  0x86   :  { %v110_v11 = vpop.eup %109 }
  0x87   :  { %v24_v12 = vmul.f32 %v108_v5, %v23_v10  ;;  %v51_v13 = vmul.f32 %v110_v11, %v49_v7 }
  0x89   :  { %v25_v14 = vmul.f32 %v24_v12, %v18_v4  ;;  %v52_v15 = vmul.f32 %v110_v11, %v51_v13 }
  0x8b   :  { %v27_v17 = vsel %vm26_vm0, %v18_v4, %v25_v14  ;;  %v53_v18 = vmul.f32 0.5, %v52_v15 }
  0x8c   :  { %v30_v19 = vsel %vm28_vm1, %v29_v16, %v27_v17 }
  0x8d   :  { %v31_v20 = vmax.f32 %v30_v19, 1e-12  ;;  %v54_v21 = vsub.f32 1.5, %v53_v18 }
  0x8f   :  { %111 = vrcp.f32 %v31_v20  ;;  %v55_v22 = vmul.f32 %v110_v11, %v54_v21  ;;  %v43_v31 = vand.u32 2147483648, %v31_v20  ;;  %v41_v33 = vand.u32 2147483647, %v31_v20 }
  0x90   :  { %vm37_vm5 = vweird.f32 %v31_v20 }
  0x91   :  { %v56_v23 = vmul.f32 %v55_v22, %v49_v7  ;;  %v44_v36 = vor.u32 1.1754944e-38, %v43_v31  ;;  %vm42_vm7 = vcmp.eq.f32.partialorder %v41_v33, 8.507059e+37 }
  0x93   :  { %v58_v25 = vsel %vm57_vm2, %v49_v7, %v56_v23 }
  0x94   :  { %v61_v26 = vsel %vm59_vm3, %v60_v24, %v58_v25 }
  0x95   :  { %v112_v27 = vpop.eup %111  ;;  %v62_v28 = vmax.f32 %v61_v26, 1e-12 }
  0x96   :  { %v33_v29 = vmul.f32 %v112_v27, %v31_v20  ;;  %vm38_vm4 = vweird.f32 %v112_v27 }
  0x97   :  { %113 = vrcp.f32 %v62_v28  ;;  %vm39_vm6 = vmor %vm37_vm5, %vm38_vm4  ;;  %v74_v42 = vand.u32 2147483648, %v62_v28  ;;  %v72_v44 = vand.u32 2147483647, %v62_v28  ;;  %vm68_vm9 = vweird.f32 %v62_v28 }
  0x98   :  { %v34_v30 = vsub.f32 1.0, %v33_v29 }
  0x99   :  { %v75_v46 = vor.u32 1.1754944e-38, %v74_v42  ;;  %vm73_vm11 = vcmp.eq.f32.partialorder %v72_v44, 8.507059e+37 }
  0x9a   :  { %v35_v32 = vmul.f32 %v112_v27, %v34_v30 }
  0x9c   :  { %v36_v34 = vadd.f32 %v112_v27, %v35_v32 }
  0x9d   :  { %v114_v35 = vpop.eup %113 }
  0x9e   :  { %v40_v37 = vsel %vm39_vm6, %v112_v27, %v36_v34  ;;  %v64_v38 = vmul.f32 %v114_v35, %v62_v28  ;;  %vm69_vm8 = vweird.f32 %v114_v35 }
  0x9f   :  { %v45_v39 = vsel %vm42_vm7, %v44_v36, %v40_v37  ;;  %vm70_vm10 = vmor %vm68_vm9, %vm69_vm8 }
  0xa0   :  { %v46_v40 = vmul.f32 %v45_v39, %v14_v0  ;;  %v65_v41 = vsub.f32 1.0, %v64_v38 }
  0xa2   :  { %v66_v43 = vmul.f32 %v114_v35, %v65_v41  ;;  %78 = vst [vmem:[%s162_s2] sm:$0xff] %v46_v40 }
  0xa4   :  { %v67_v45 = vadd.f32 %v114_v35, %v66_v43 }
  0xa6   :  { %v71_v47 = vsel %vm70_vm10, %v114_v35, %v67_v45 }
  0xa7   :  { %v76_v48 = vsel %vm73_vm11, %v75_v46, %v71_v47 }
  0xa8   :  { %v77_v49 = vmul.f32 %v76_v48, %v146_v2 }
  0xaa   :  { %v80_v50 = vsub.f32 %v46_v40, %v77_v49  ;;  %79 = vst [vmem:[%s163_s3] sm:$0xff] %v77_v49 }
  0xac   :  { %v81_v51 = vmul.f32 %v80_v50, %v80_v50 }
  0xae   :  { %82 = vadd.xlane.f32.xlu1 %v81_v51 }
 0x121   :  { %v83_v52 = vpop.xlane.xlu1 %82 }
 0x122   :  { %v84_v53 = vrot.slane %v83_v52, 4 }
 0x124   :  { %v85_v54 = vadd.f32 %v84_v53, %v83_v52 }
 0x126   :  { %v86_v55 = vrot.slane %v85_v54, 2 }
 0x128   :  { %v87_v56 = vadd.f32 %v86_v55, %v85_v54 }
 0x12a   :  { %v88_v57 = vrot.slane %v87_v56, 1 }
 0x12c   :  { %v89_v58 = vadd.f32 %v88_v57, %v87_v56 }
 0x12e   :  { %105 = vpush %v89_v58 }
 0x15f   :  { %s106_s2 = spop %105 }
 0x160   :  { %v91_v59 = vstv %s106_s2 }
 0x161   :  { %92 = vst [vmem:[%s164_s4] sm:$0x1] %v91_v59 }

// kernel: graphau_forward.5
= control target key start
LH: loop header
LB: loop body
LE: loop exit
PB: predicated region body
PF: predicated region fallthrough
CT: control target
= control target key end

     0   :  { %s719_s1 = inlined_call_operand.vmem [shape: bf16[128,128], index: 1, kind: input, shape index: {}]   ;;  %s720_s0 = inlined_call_operand.vmem [shape: bf16[128,128], index: 0, kind: input, shape index: {}]   ;;  %s721_s2 = inlined_call_operand.vmem [shape: f32[128,128], index: 2, kind: input, shape index: {}, may-alias: {2,4}]   ;;  %s722_s4 = inlined_call_operand.vmem [shape: f32[128,128], index: 4, kind: output, shape index: {1}, may-alias: {2,4}]   ;;  %s723_s3 = inlined_call_operand.vmem [shape: bf16[128,128], index: 3, kind: output, shape index: {0}]  }
   0x1   :  { %v446_v0 = vld [vmem:[%s719_s1 + $0x38] sm:$0xff]  ;;  %v445_v1 = vld [vmem:[%s719_s1 + $0x30] sm:$0xff]  ;;  %v444_v2 = vld [vmem:[%s719_s1 + $0x28] sm:$0xff] }
   0x2   :  { %185 = vmatpush.bf16.msra.mxu0 %v446_v0  ;;  %502 = vmatpush.bf16.msra.mxu1 %v446_v0  ;;  %v443_v3 = vld [vmem:[%s719_s1 + $0x20] sm:$0xff]  ;;  %v442_v4 = vld [vmem:[%s719_s1 + $0x18] sm:$0xff]  ;;  %v441_v5 = vld [vmem:[%s719_s1 + $0x10] sm:$0xff] }
   0x3   :  { %503 = vmatpush.bf16.msra.mxu2 %v446_v0  ;;  %504 = vmatpush.bf16.msra.mxu3 %v446_v0  ;;  %v440_v6 = vld [vmem:[%s719_s1 + $0x8] sm:$0xff]  ;;  %v439_v7 = vld [vmem:[%s719_s1] sm:$0xff]  ;;  %v449_v9 = vld [vmem:[%s720_s0 + $0x10] sm:$0xff] }
   0x4   :  { %v447_v8 = vld [vmem:[%s720_s0] sm:$0xff]  ;;  %v453_v11 = vld [vmem:[%s720_s0 + $0x30] sm:$0xff]  ;;  %v448_v12 = vld [vmem:[%s720_s0 + $0x8] sm:$0xff] }
   0x5   :  { %v451_v10 = vld [vmem:[%s720_s0 + $0x20] sm:$0xff]  ;;  %v450_v13 = vld [vmem:[%s720_s0 + $0x18] sm:$0xff]  ;;  %v452_v14 = vld [vmem:[%s720_s0 + $0x28] sm:$0xff] }
   0x6   :  { %186 = vmatpush.bf16.msra.mxu0 %v445_v1  ;;  %505 = vmatpush.bf16.msra.mxu1 %v445_v1  ;;  %v454_v15 = vld [vmem:[%s720_s0 + $0x38] sm:$0xff]  ;;  %v317_v16 = vld [vmem:[%s721_s2] sm:$0xff] }
   0x7   :  { %506 = vmatpush.bf16.msra.mxu2 %v445_v1  ;;  %507 = vmatpush.bf16.msra.mxu3 %v445_v1  ;;  %v321_v17 = vld [vmem:[%s721_s2 + $0x20] sm:$0xff] }
   0xa   :  { %187 = vmatpush.bf16.msra.mxu0 %v444_v2  ;;  %508 = vmatpush.bf16.msra.mxu1 %v444_v2 }
   0xb   :  { %509 = vmatpush.bf16.msra.mxu2 %v444_v2  ;;  %510 = vmatpush.bf16.msra.mxu3 %v444_v2 }
   0xe   :  { %188 = vmatpush.bf16.msra.mxu0 %v443_v3  ;;  %511 = vmatpush.bf16.msra.mxu1 %v443_v3 }
   0xf   :  { %512 = vmatpush.bf16.msra.mxu2 %v443_v3  ;;  %513 = vmatpush.bf16.msra.mxu3 %v443_v3 }
  0x12   :  { %189 = vmatpush.bf16.msra.mxu0 %v442_v4  ;;  %514 = vmatpush.bf16.msra.mxu1 %v442_v4 }
  0x13   :  { %515 = vmatpush.bf16.msra.mxu2 %v442_v4  ;;  %516 = vmatpush.bf16.msra.mxu3 %v442_v4 }
  0x16   :  { %190 = vmatpush.bf16.msra.mxu0 %v441_v5  ;;  %517 = vmatpush.bf16.msra.mxu1 %v441_v5 }
  0x17   :  { %518 = vmatpush.bf16.msra.mxu2 %v441_v5  ;;  %519 = vmatpush.bf16.msra.mxu3 %v441_v5 }
  0x1a   :  { %191 = vmatpush.bf16.msra.mxu0 %v440_v6  ;;  %520 = vmatpush.bf16.msra.mxu1 %v440_v6 }
  0x1b   :  { %521 = vmatpush.bf16.msra.mxu2 %v440_v6  ;;  %522 = vmatpush.bf16.msra.mxu3 %v440_v6 }
  0x1e   :  { %192 = vmatpush.bf16.msra.mxu0 %v439_v7  ;;  %523 = vmatpush.bf16.msra.mxu1 %v439_v7 }
  0x1f   :  { %524 = vmatpush.bf16.msra.mxu2 %v439_v7  ;;  %525 = vmatpush.bf16.msra.mxu3 %v439_v7 }
  0x21   :  { %193 = vmatmul.bf16.vlgmr.msra.gmra.mxu0 %v447_v8  ;;  %203 = vmatmul.bf16.vlgmr.msra.gmra.mxu1 %v449_v9 }
  0x22   :  { %213 = vmatmul.bf16.vlgmr.msra.gmra.mxu2 %v451_v10  ;;  %223 = vmatmul.bf16.vlgmr.msra.gmra.mxu3 %v453_v11 }
  0x31   :  { %198 = vmatmul.bf16.gmra.mxu0 %v448_v12  ;;  %208 = vmatmul.bf16.gmra.mxu1 %v450_v13 }
  0x32   :  { %218 = vmatmul.bf16.gmra.mxu2 %v452_v14  ;;  %228 = vmatmul.bf16.gmra.mxu3 %v454_v15 }
  0x9e   :  { %v194_v18 = vpop.f32.mrf.mxu0  ;;  %v204_v19 = vpop.f32.mrf.mxu1 }
  0x9f   :  { %v333_v20 = vadd.f32 %v317_v16, %v194_v18  ;;  %v337_v21 = vadd.f32 %v321_v17, %v204_v19 }
  0xa1   :  { %349 = vst [vmem:[%s722_s4] sm:$0xff] %v333_v20 }
  0xa2   :  { %353 = vst [vmem:[%s722_s4 + $0x20] sm:$0xff] %v337_v21 }
  0xa5   :  { %v214_v25 = vpop.f32.mrf.mxu2  ;;  %v224_v26 = vpop.f32.mrf.mxu3 }
  0xa6   :  { %v196_v29 = vpop.f32.mrf.mxu0  ;;  %v206_v30 = vpop.f32.mrf.mxu1 }
  0xa7   :  { %v458_v32 = vpack.c.bf16 %v196_v29, %v194_v18  ;;  %v468_v34 = vpack.c.bf16 %v206_v30, %v204_v19 }
  0xa9   :  { %v325_v22 = vld [vmem:[%s721_s2 + $0x40] sm:$0xff]  ;;  %v318_v24 = vld [vmem:[%s721_s2 + $0x8] sm:$0xff]  ;;  %459 = vst [vmem:[%s723_s3] sm:$0xff] %v458_v32  }
  0xaa   :  { %v329_v23 = vld [vmem:[%s721_s2 + $0x60] sm:$0xff]  ;;  %v341_v27 = vadd.f32 %v325_v22, %v214_v25  ;;  %v322_v31 = vld [vmem:[%s721_s2 + $0x28] sm:$0xff]  ;;  %v334_v33 = vadd.f32 %v318_v24, %v196_v29  ;;  %496 = vst [vmem:[%s723_s3 + $0x10] sm:$0xff] %v468_v34  }
  0xab   :  { %v345_v28 = vadd.f32 %v329_v23, %v224_v26  ;;  %v338_v35 = vadd.f32 %v322_v31, %v206_v30 }
  0xac   :  { %357 = vst [vmem:[%s722_s4 + $0x40] sm:$0xff] %v341_v27 }
  0xad   :  { %361 = vst [vmem:[%s722_s4 + $0x60] sm:$0xff] %v345_v28  ;;  %v216_v38 = vpop.f32.mrf.mxu2  ;;  %v226_v39 = vpop.f32.mrf.mxu3 }
  0xae   :  { %350 = vst [vmem:[%s722_s4 + $0x8] sm:$0xff] %v334_v33  ;;  %v478_v41 = vpack.c.bf16 %v216_v38, %v214_v25  ;;  %v488_v43 = vpack.c.bf16 %v226_v39, %v224_v26  ;;  %v199_v44 = vpop.f32.mrf.mxu0  ;;  %v209_v45 = vpop.f32.mrf.mxu1 }
  0xb0   :  { %498 = vst [vmem:[%s723_s3 + $0x20] sm:$0xff] %v478_v41  }
  0xb1   :  { %500 = vst [vmem:[%s723_s3 + $0x30] sm:$0xff] %v488_v43  }
  0xb5   :  { %v326_v36 = vld [vmem:[%s721_s2 + $0x48] sm:$0xff]  ;;  %v219_v53 = vpop.f32.mrf.mxu2  ;;  %v229_v54 = vpop.f32.mrf.mxu3 }
  0xb6   :  { %v330_v37 = vld [vmem:[%s721_s2 + $0x68] sm:$0xff]  ;;  %v342_v42 = vadd.f32 %v326_v36, %v216_v38  ;;  %v201_v57 = vpop.f32.mrf.mxu0  ;;  %v211_v58 = vpop.f32.mrf.mxu1 }
  0xb7   :  { %354 = vst [vmem:[%s722_s4 + $0x28] sm:$0xff] %v338_v35  ;;  %v346_v47 = vadd.f32 %v330_v37, %v226_v39  ;;  %v463_v60 = vpack.c.bf16 %v201_v57, %v199_v44  ;;  %v473_v62 = vpack.c.bf16 %v211_v58, %v209_v45 }
  0xb9   :  { %495 = vst [vmem:[%s723_s3 + $0x8] sm:$0xff] %v463_v60  }
  0xba   :  { %497 = vst [vmem:[%s723_s3 + $0x18] sm:$0xff] %v473_v62  }
  0xbd   :  { %v221_v2 = vpop.f32.mrf.mxu2  ;;  %v231_v3 = vpop.f32.mrf.mxu3 }
  0xbe   :  { %v319_v40 = vld [vmem:[%s721_s2 + $0x10] sm:$0xff]  ;;  %v483_v4 = vpack.c.bf16 %v221_v2, %v219_v53  ;;  %v493_v6 = vpack.c.bf16 %v231_v3, %v229_v54 }
  0xbf   :  { %v323_v46 = vld [vmem:[%s721_s2 + $0x30] sm:$0xff]  ;;  %v335_v48 = vadd.f32 %v319_v40, %v199_v44 }
  0xc0   :  { %358 = vst [vmem:[%s722_s4 + $0x48] sm:$0xff] %v342_v42  ;;  %v339_v49 = vadd.f32 %v323_v46, %v209_v45 }
  0xc1   :  { %362 = vst [vmem:[%s722_s4 + $0x68] sm:$0xff] %v346_v47 }
  0xc2   :  { %499 = vst [vmem:[%s723_s3 + $0x28] sm:$0xff] %v483_v4  }
  0xc3   :  { %501 = vst [vmem:[%s723_s3 + $0x38] sm:$0xff] %v493_v6  }
  0xc8   :  { %v327_v50 = vld [vmem:[%s721_s2 + $0x50] sm:$0xff] }
  0xc9   :  { %v331_v51 = vld [vmem:[%s721_s2 + $0x70] sm:$0xff]  ;;  %v343_v55 = vadd.f32 %v327_v50, %v219_v53 }
  0xca   :  { %351 = vst [vmem:[%s722_s4 + $0x10] sm:$0xff] %v335_v48  ;;  %v347_v56 = vadd.f32 %v331_v51, %v229_v54 }
  0xd1   :  { %v320_v52 = vld [vmem:[%s721_s2 + $0x18] sm:$0xff] }
  0xd2   :  { %355 = vst [vmem:[%s722_s4 + $0x30] sm:$0xff] %v339_v49  ;;  %v336_v61 = vadd.f32 %v320_v52, %v201_v57 }
  0xd9   :  { %v324_v59 = vld [vmem:[%s721_s2 + $0x38] sm:$0xff] }
  0xda   :  { %359 = vst [vmem:[%s722_s4 + $0x50] sm:$0xff] %v343_v55  ;;  %v340_v63 = vadd.f32 %v324_v59, %v211_v58 }
  0xdb   :  { %363 = vst [vmem:[%s722_s4 + $0x70] sm:$0xff] %v347_v56 }
  0xdc   :  { %352 = vst [vmem:[%s722_s4 + $0x18] sm:$0xff] %v336_v61 }
  0xe3   :  { %v328_v0 = vld [vmem:[%s721_s2 + $0x58] sm:$0xff] }
  0xe4   :  { %v332_v1 = vld [vmem:[%s721_s2 + $0x78] sm:$0xff]  ;;  %v344_v5 = vadd.f32 %v328_v0, %v221_v2 }
  0xe5   :  { %356 = vst [vmem:[%s722_s4 + $0x38] sm:$0xff] %v340_v63  ;;  %v348_v7 = vadd.f32 %v332_v1, %v231_v3 }
  0xe6   :  { %360 = vst [vmem:[%s722_s4 + $0x58] sm:$0xff] %v344_v5 }
  0xe7   :  { %364 = vst [vmem:[%s722_s4 + $0x78] sm:$0xff] %v348_v7 }

// kernel: graphau_forward.6
= control target key start
LH: loop header
LB: loop body
LE: loop exit
PB: predicated region body
PF: predicated region fallthrough
CT: control target
= control target key end

     0   :  { %s745_s0 = inlined_call_operand.vmem [shape: bf16[128,128], index: 0, kind: input, shape index: {}]   ;;  %s746_s1 = inlined_call_operand.vmem [shape: bf16[128,128], index: 1, kind: input, shape index: {}]   ;;  %s747_s2 = inlined_call_operand.vmem [shape: f32[128,128], index: 2, kind: input, shape index: {}, may-alias: {2,4}]   ;;  %s748_s3 = inlined_call_operand.hbm [shape: bf16[128,128], index: 3, kind: output, shape index: {0}]   ;;  %s749_s4 = inlined_call_operand.vmem [shape: f32[128,128], index: 4, kind: output, shape index: {1}, may-alias: {2,4}]  }
   0x1   :  { %v461_v0 = vld [vmem:[%s746_s1 + $0x38] sm:$0xff]  ;;  %v460_v1 = vld [vmem:[%s746_s1 + $0x30] sm:$0xff] }
   0x2   :  { %186 = vmatpush.bf16.msra.mxu0 %v461_v0  ;;  %517 = vmatpush.bf16.msra.mxu1 %v461_v0 }
   0x3   :  { %518 = vmatpush.bf16.msra.mxu2 %v461_v0  ;;  %519 = vmatpush.bf16.msra.mxu3 %v461_v0 }
   0x4   :  { %10 = vsyncpa [#allocation4], 0  ;;  %v459_v2 = vld [vmem:[%s746_s1 + $0x28] sm:$0xff]  ;;  %v458_v3 = vld [vmem:[%s746_s1 + $0x20] sm:$0xff]  ;;  %s570_s24 = smov [#allocation3]   ;;  %s372_s27 = sshll.u32 %s748_s3, 4  ;;  %s373_s27 = int_to_ptr.hbm [resolvable:$true] %s372_s27 }
   0x5   :  { %v457_v4 = vld [vmem:[%s746_s1 + $0x18] sm:$0xff]  ;;  %v456_v5 = vld [vmem:[%s746_s1 + $0x10] sm:$0xff]  ;;  %v455_v6 = vld [vmem:[%s746_s1 + $0x8] sm:$0xff]  ;;  %s370_s25 = sshll.u32 %s570_s24, 4  ;;  %s571_s5 = smov 64   ;;  %s371_s25 = int_to_ptr.vmem [resolvable:$true] %s370_s25 }
   0x6   :  { %187 = vmatpush.bf16.msra.mxu0 %v460_v1  ;;  %520 = vmatpush.bf16.msra.mxu1 %v460_v1  ;;  %v454_v7 = vld [vmem:[%s746_s1] sm:$0xff]  ;;  %v464_v9 = vld [vmem:[%s745_s0 + $0x10] sm:$0xff]  ;;  %v463_v12 = vld [vmem:[%s745_s0 + $0x8] sm:$0xff]  ;;  %s572_s6 = smov 4  }
   0x7   :  { %521 = vmatpush.bf16.msra.mxu2 %v460_v1  ;;  %522 = vmatpush.bf16.msra.mxu3 %v460_v1  ;;  %v462_v8 = vld [vmem:[%s745_s0] sm:$0xff]  ;;  %v468_v11 = vld [vmem:[%s745_s0 + $0x30] sm:$0xff]  ;;  %v465_v13 = vld [vmem:[%s745_s0 + $0x18] sm:$0xff] }
   0x8   :  { %v466_v10 = vld [vmem:[%s745_s0 + $0x20] sm:$0xff]  ;;  %v467_v14 = vld [vmem:[%s745_s0 + $0x28] sm:$0xff]  ;;  %v469_v15 = vld [vmem:[%s745_s0 + $0x38] sm:$0xff] }
   0x9   :  { %v318_v16 = vld [vmem:[%s747_s2] sm:$0xff] }
   0xa   :  { %188 = vmatpush.bf16.msra.mxu0 %v459_v2  ;;  %523 = vmatpush.bf16.msra.mxu1 %v459_v2  ;;  %v322_v17 = vld [vmem:[%s747_s2 + $0x20] sm:$0xff] }
   0xb   :  { %524 = vmatpush.bf16.msra.mxu2 %v459_v2  ;;  %525 = vmatpush.bf16.msra.mxu3 %v459_v2 }
   0xe   :  { %189 = vmatpush.bf16.msra.mxu0 %v458_v3  ;;  %526 = vmatpush.bf16.msra.mxu1 %v458_v3 }
   0xf   :  { %527 = vmatpush.bf16.msra.mxu2 %v458_v3  ;;  %528 = vmatpush.bf16.msra.mxu3 %v458_v3 }
  0x12   :  { %190 = vmatpush.bf16.msra.mxu0 %v457_v4  ;;  %529 = vmatpush.bf16.msra.mxu1 %v457_v4 }
  0x13   :  { %530 = vmatpush.bf16.msra.mxu2 %v457_v4  ;;  %531 = vmatpush.bf16.msra.mxu3 %v457_v4 }
  0x16   :  { %191 = vmatpush.bf16.msra.mxu0 %v456_v5  ;;  %532 = vmatpush.bf16.msra.mxu1 %v456_v5 }
  0x17   :  { %533 = vmatpush.bf16.msra.mxu2 %v456_v5  ;;  %534 = vmatpush.bf16.msra.mxu3 %v456_v5 }
  0x1a   :  { %192 = vmatpush.bf16.msra.mxu0 %v455_v6  ;;  %535 = vmatpush.bf16.msra.mxu1 %v455_v6 }
  0x1b   :  { %536 = vmatpush.bf16.msra.mxu2 %v455_v6  ;;  %537 = vmatpush.bf16.msra.mxu3 %v455_v6 }
  0x1e   :  { %193 = vmatpush.bf16.msra.mxu0 %v454_v7  ;;  %538 = vmatpush.bf16.msra.mxu1 %v454_v7 }
  0x1f   :  { %539 = vmatpush.bf16.msra.mxu2 %v454_v7  ;;  %540 = vmatpush.bf16.msra.mxu3 %v454_v7 }
  0x21   :  { %194 = vmatmul.bf16.vlgmr.msra.gmra.mxu0 %v462_v8  ;;  %204 = vmatmul.bf16.vlgmr.msra.gmra.mxu1 %v464_v9 }
  0x22   :  { %214 = vmatmul.bf16.vlgmr.msra.gmra.mxu2 %v466_v10  ;;  %224 = vmatmul.bf16.vlgmr.msra.gmra.mxu3 %v468_v11 }
  0x31   :  { %199 = vmatmul.bf16.gmra.mxu0 %v463_v12  ;;  %209 = vmatmul.bf16.gmra.mxu1 %v465_v13 }
  0x32   :  { %219 = vmatmul.bf16.gmra.mxu2 %v467_v14  ;;  %229 = vmatmul.bf16.gmra.mxu3 %v469_v15 }
  0x9e   :  { %v195_v18 = vpop.f32.mrf.mxu0  ;;  %v205_v19 = vpop.f32.mrf.mxu1 }
  0x9f   :  { %v334_v20 = vadd.f32 %v318_v16, %v195_v18  ;;  %v338_v21 = vadd.f32 %v322_v17, %v205_v19 }
  0xa1   :  { %350 = vst [vmem:[%s749_s4] sm:$0xff] %v334_v20 }
  0xa2   :  { %354 = vst [vmem:[%s749_s4 + $0x20] sm:$0xff] %v338_v21 }
  0xa5   :  { %v215_v25 = vpop.f32.mrf.mxu2  ;;  %v225_v26 = vpop.f32.mrf.mxu3 }
  0xa6   :  { %v197_v29 = vpop.f32.mrf.mxu0  ;;  %v207_v30 = vpop.f32.mrf.mxu1 }
  0xa7   :  { %v473_v32 = vpack.c.bf16 %v197_v29, %v195_v18  ;;  %v483_v34 = vpack.c.bf16 %v207_v30, %v205_v19 }
  0xa9   :  { %v326_v22 = vld [vmem:[%s747_s2 + $0x40] sm:$0xff]  ;;  %v319_v24 = vld [vmem:[%s747_s2 + $0x8] sm:$0xff]  ;;  %474 = vst [vmem:[#allocation3] sm:$0xff] %v473_v32  }
  0xaa   :  { %v330_v23 = vld [vmem:[%s747_s2 + $0x60] sm:$0xff]  ;;  %v342_v27 = vadd.f32 %v326_v22, %v215_v25  ;;  %v323_v31 = vld [vmem:[%s747_s2 + $0x28] sm:$0xff]  ;;  %v335_v33 = vadd.f32 %v319_v24, %v197_v29  ;;  %511 = vst [vmem:[#allocation3 + $0x10] sm:$0xff] %v483_v34  }
  0xab   :  { %v346_v28 = vadd.f32 %v330_v23, %v225_v26  ;;  %v339_v35 = vadd.f32 %v323_v31, %v207_v30 }
  0xac   :  { %358 = vst [vmem:[%s749_s4 + $0x40] sm:$0xff] %v342_v27 }
  0xad   :  { %362 = vst [vmem:[%s749_s4 + $0x60] sm:$0xff] %v346_v28  ;;  %v217_v38 = vpop.f32.mrf.mxu2  ;;  %v227_v39 = vpop.f32.mrf.mxu3 }
  0xae   :  { %351 = vst [vmem:[%s749_s4 + $0x8] sm:$0xff] %v335_v33  ;;  %v493_v41 = vpack.c.bf16 %v217_v38, %v215_v25  ;;  %v503_v43 = vpack.c.bf16 %v227_v39, %v225_v26  ;;  %v200_v44 = vpop.f32.mrf.mxu0  ;;  %v210_v45 = vpop.f32.mrf.mxu1 }
  0xb0   :  { %513 = vst [vmem:[#allocation3 + $0x20] sm:$0xff] %v493_v41  }
  0xb1   :  { %515 = vst [vmem:[#allocation3 + $0x30] sm:$0xff] %v503_v43  }
  0xb5   :  { %v327_v36 = vld [vmem:[%s747_s2 + $0x48] sm:$0xff]  ;;  %v220_v53 = vpop.f32.mrf.mxu2  ;;  %v230_v54 = vpop.f32.mrf.mxu3 }
  0xb6   :  { %v331_v37 = vld [vmem:[%s747_s2 + $0x68] sm:$0xff]  ;;  %v343_v42 = vadd.f32 %v327_v36, %v217_v38  ;;  %v202_v57 = vpop.f32.mrf.mxu0  ;;  %v212_v58 = vpop.f32.mrf.mxu1 }
  0xb7   :  { %355 = vst [vmem:[%s749_s4 + $0x28] sm:$0xff] %v339_v35  ;;  %v347_v47 = vadd.f32 %v331_v37, %v227_v39  ;;  %v478_v60 = vpack.c.bf16 %v202_v57, %v200_v44  ;;  %v488_v62 = vpack.c.bf16 %v212_v58, %v210_v45 }
  0xb9   :  { %510 = vst [vmem:[#allocation3 + $0x8] sm:$0xff] %v478_v60  }
  0xba   :  { %512 = vst [vmem:[#allocation3 + $0x18] sm:$0xff] %v488_v62  }
  0xbd   :  { %v222_v2 = vpop.f32.mrf.mxu2  ;;  %v232_v3 = vpop.f32.mrf.mxu3 }
  0xbe   :  { %v320_v40 = vld [vmem:[%s747_s2 + $0x10] sm:$0xff]  ;;  %v498_v4 = vpack.c.bf16 %v222_v2, %v220_v53  ;;  %v508_v6 = vpack.c.bf16 %v232_v3, %v230_v54 }
  0xbf   :  { %v324_v46 = vld [vmem:[%s747_s2 + $0x30] sm:$0xff]  ;;  %v336_v48 = vadd.f32 %v320_v40, %v200_v44 }
  0xc0   :  { %359 = vst [vmem:[%s749_s4 + $0x48] sm:$0xff] %v343_v42  ;;  %v340_v49 = vadd.f32 %v324_v46, %v210_v45 }
  0xc1   :  { %363 = vst [vmem:[%s749_s4 + $0x68] sm:$0xff] %v347_v47 }
  0xc2   :  { %514 = vst [vmem:[#allocation3 + $0x28] sm:$0xff] %v498_v4  }
  0xc3   :  { %516 = vst [vmem:[#allocation3 + $0x38] sm:$0xff] %v508_v6  }
  0xc4   :  { %378 = dma.vmem_to_hbm [thread:$0]  %s371_s25, 1024, %s373_s27, [#allocation4], %s571_s5, %s571_s5, %s572_s6  }
  0xc8   :  { %v328_v50 = vld [vmem:[%s747_s2 + $0x50] sm:$0xff] }
  0xc9   :  { %v332_v51 = vld [vmem:[%s747_s2 + $0x70] sm:$0xff]  ;;  %v344_v55 = vadd.f32 %v328_v50, %v220_v53 }
  0xca   :  { %352 = vst [vmem:[%s749_s4 + $0x10] sm:$0xff] %v336_v48  ;;  %v348_v56 = vadd.f32 %v332_v51, %v230_v54 }
  0xd1   :  { %v321_v52 = vld [vmem:[%s747_s2 + $0x18] sm:$0xff] }
  0xd2   :  { %356 = vst [vmem:[%s749_s4 + $0x30] sm:$0xff] %v340_v49  ;;  %v337_v61 = vadd.f32 %v321_v52, %v202_v57 }
  0xd9   :  { %v325_v59 = vld [vmem:[%s747_s2 + $0x38] sm:$0xff] }
  0xda   :  { %360 = vst [vmem:[%s749_s4 + $0x50] sm:$0xff] %v344_v55  ;;  %v341_v63 = vadd.f32 %v325_v59, %v212_v58 }
  0xdb   :  { %364 = vst [vmem:[%s749_s4 + $0x70] sm:$0xff] %v348_v56 }
  0xdc   :  { %353 = vst [vmem:[%s749_s4 + $0x18] sm:$0xff] %v337_v61 }
  0xe3   :  { %v329_v0 = vld [vmem:[%s747_s2 + $0x58] sm:$0xff] }
  0xe4   :  { %v333_v1 = vld [vmem:[%s747_s2 + $0x78] sm:$0xff]  ;;  %v345_v5 = vadd.f32 %v329_v0, %v222_v2 }
  0xe5   :  { %357 = vst [vmem:[%s749_s4 + $0x38] sm:$0xff] %v341_v63  ;;  %v349_v7 = vadd.f32 %v333_v1, %v232_v3 }
  0xe6   :  { %361 = vst [vmem:[%s749_s4 + $0x58] sm:$0xff] %v345_v5 }
  0xe7   :  { %365 = vst [vmem:[%s749_s4 + $0x78] sm:$0xff] %v349_v7 }
  0xe8   :  { %568 = dma.done.wait [#allocation4], 1024  }
  0xe9   :  { %569 = vsyncadd [#allocation4], 4294966272 }
  0xea   :  { %387 = vsyncpa [#allocation4], 1 }

// kernel: graphau_forward.8
= control target key start
LH: loop header
LB: loop body
LE: loop exit
PB: predicated region body
PF: predicated region fallthrough
CT: control target
= control target key end

     0   :  { %v86_v12 = vlaneseq  ;;  %vm105_vm3 = vcmask 64512   ;;  %v128_v21 = vmov 0.0   ;;  %s159_s1 = inlined_call_operand.vmem [shape: f32[8,128], index: 1, kind: input, shape index: {}, may-alias: {0,1}]   ;;  %s160_s0 = inlined_call_operand.vmem [shape: f32[8,128], index: 0, kind: input, shape index: {}, may-alias: {0,1}]   ;;  %s161_s2 = inlined_call_operand.vmem [shape: f32[1,128], index: 2, kind: output, shape index: {}]  }
   0x1   :  { %v21_v0 = vld [vmem:[%s159_s1] sm:$0xff]  ;;  %15 = vst [vmem:[%s161_s2] sm:$0x1] %v128_v21 }
   0x2   :  { %v25_v1 = vmul.f32 %v21_v0, %v21_v0  ;;  %43 = vmatpush.xpose.msra.mxu0 %v21_v0  ;;  %v20_v2 = vld [vmem:[%s160_s0] sm:$0xff]  ;;  %v87_v15 = vshrl.u32 %v86_v12, 7  ;;  %v92_v16 = vand.u32 127, %v86_v12 }
   0x3   :  { %v22_v3 = vmul.f32 %v20_v2, %v20_v2 }
   0x4   :  { %26 = vadd.xlane.f32.xlu0 %v25_v1  ;;  %vm95_vm0 = vcmp.gt.s32.totalorder %v92_v16, %v87_v15  ;;  %vm98_vm1 = vcmp.lt.s32.totalorder %v92_v16, 8 }
   0x5   :  { %44 = vmatmul.f32.vlgmr.msra.gmra.mxu0 %v20_v2  ;;  %vm99_vm2 = vmand %vm95_vm0, %vm98_vm1 }
   0x8   :  { %v100_v29 = vld [vmem:[%s161_s2] sm:$0x1] }
   0xc   :  { %23 = vadd.xlane.f32.xlu0 %v22_v3 }
  0x77   :  { %v27_v4 = vpop.xlane.xlu0 %26 }
  0x78   :  { %48 = vxpose.xlu1.b32.start.end [1/1] (short) (narrow) %v27_v4, 8 }
  0x7f   :  { %v24_v7 = vpop.xlane.xlu0 %23 }
  0x82   :  { %v45_v5 = vpop.f32.mrf.mxu0 }
  0x83   :  { %v82_v9 = vmul.f32 2.0, %v45_v5 }
 0x11c   :  { %v64_v6 = vpop.trf.xlu1 }
 0x11d   :  { %v80_v8 = vperm.slane %v64_v6, 0 }
 0x11f   :  { %v81_v10 = vadd.f32 %v80_v8, %v24_v7 }
 0x121   :  { %v83_v11 = vsub.f32 %v81_v10, %v82_v9 }
 0x123   :  { %v84_v13 = vmax.f32 %v83_v11, 0.0 }
 0x125   :  { %v101_v14 = vmul.f32 -2.0, %v84_v13 }
 0x127   :  { %v102_v17 = vmul.f32 1.442695, %v101_v14 }
 0x129   :  { %126 = vpow2.f32 %v102_v17 }
 0x12f   :  { %v127_v18 = vpop.eup %126 }
 0x130   :  { %v104_v19 = vsel %vm99_vm2, %v127_v18, 0.0 }
 0x131   :  { %v106_v20 = vsel %vm105_vm3, %v104_v19, 0.0 }
 0x132   :  { %107 = vadd.xlane.f32.xlu1 %v106_v20 }
 0x1a5   :  { %v108_v22 = vpop.xlane.xlu1 %107 }
 0x1a6   :  { %v109_v23 = vrot.slane %v108_v22, 4 }
 0x1a8   :  { %v110_v24 = vadd.f32 %v109_v23, %v108_v22 }
 0x1aa   :  { %v111_v25 = vrot.slane %v110_v24, 2 }
 0x1ac   :  { %v112_v26 = vadd.f32 %v111_v25, %v110_v24 }
 0x1ae   :  { %v113_v27 = vrot.slane %v112_v26, 1 }
 0x1b0   :  { %v114_v28 = vadd.f32 %v113_v27, %v112_v26 }
 0x1b2   :  { %123 = vpush %v114_v28 }
 0x1e3   :  { %s124_s15 = spop %123 }
 0x1e4   :  { %v116_v30 = vstv %s124_s15 }
 0x1e5   :  { %v117_v31 = vadd.f32 %v116_v30, %v100_v29 }
 0x1e7   :  { %118 = vst [vmem:[%s161_s2] sm:$0x1] %v117_v31 }

</bundles_post_ra>
